<compile_context>
chip_gen: v7x
topology: tpu7x:2x2x1
jax: 0.10.0
libtpu: 0.0.40
codegen_flags: <defaults>
</compile_context>

<pallas_src>
import math

import jax
import jax.numpy as jnp
from jax import lax
from jax.experimental import pallas as pl
from jax.experimental.pallas import tpu as pltpu


def flash_mhsa_kernel(q_ref, k_ref, v_ref, wo_ref, bo_ref, o_ref,
                      m_sc, l_sc, pv_sc, out_sc):
    f32 = jnp.float32
    h, kv = pl.program_id(2), pl.program_id(3)
    n_h, n_kv = pl.num_programs(2), pl.num_programs(3)

    @pl.when(jnp.logical_and(h == 0, kv == 0))
    def _():
        out_sc[...] = jnp.zeros_like(out_sc)

    @pl.when(kv == 0)
    def _():
        m_sc[...] = jnp.full_like(m_sc, -jnp.inf)
        l_sc[...] = jnp.zeros_like(l_sc)
        pv_sc[...] = jnp.zeros_like(pv_sc)

    q = q_ref[0, 0]                      # (TQ, d_k)  scale already folded in
    k = k_ref[0, 0]                      # (TK, d_k)
    v = v_ref[0, 0]                      # (TK, d_k)

    # scores = q_h @ k_h^T without an explicit XLU transpose: contract the
    # last dims of both operands.  f32 accumulation.
    s = lax.dot_general(q, k, (((1,), (1,)), ((), ())),
                        preferred_element_type=f32)          # (TQ, TK)

    # Online (numerically stable) softmax; all statistics kept in f32.
    m_prev = m_sc[...]
    m_new = jnp.maximum(m_prev, jnp.max(s, axis=-1, keepdims=True))
    alpha = jnp.exp(m_prev - m_new)
    p = jnp.exp(s - m_new)
    l_sc[...] = alpha * l_sc[...] + jnp.sum(p, axis=-1, keepdims=True)
    pv_sc[...] = alpha * pv_sc[...] + jnp.dot(
        p.astype(v.dtype), v, preferred_element_type=f32)    # (TQ, d_k)
    m_sc[...] = m_new

    @pl.when(kv == n_kv - 1)
    def _():
        # Normalize once per head, then fold this head straight into the
        # output projection: out += (P V / l) @ Wo[h]  -- no lane-axis concat.
        pv = pv_sc[...] * pl.reciprocal(l_sc[...], approx=False)
        out_sc[...] += jnp.dot(pv.astype(wo_ref.dtype), wo_ref[0],
                               preferred_element_type=f32)   # (TQ, D)

    @pl.when(jnp.logical_and(h == n_h - 1, kv == n_kv - 1))
    def _():
        o_ref[0] = (out_sc[...] + bo_ref[...]).astype(o_ref.dtype)


def _pick_tiles(seq_len, compute_dtype):
    """Query/KV tile sizes.  Large tiles amortize per-step overhead, but are
    capped (256 f32 / 512 bf16) so score tiles + accumulators fit v7x's
    64 MiB VMEM."""
    cap = 512 if jnp.dtype(compute_dtype).itemsize <= 2 else 256
    def pick(n):
        if n <= 128:
            return n
        for c in (512, 256, 128):
            if c <= cap and n % c == 0:
                return c
        return n  # fall back to the full (legal) extent
    return pick(seq_len), pick(seq_len)


def _vmem_limit_bytes(tq, tk, d_k, d_model, compute_dtype, out_dtype):
    """Working-set derived VMEM limit with headroom, clamped under v7x's 64 MiB."""
    lane = lambda n: -(-n // 128) * 128
    sub = lambda n: -(-n // 8) * 8
    cb = jnp.dtype(compute_dtype).itemsize
    ob = jnp.dtype(out_dtype).itemsize
    blocks = 2 * (sub(tq) * lane(d_k) * cb            # q tile (double-buffered)
                  + 2 * sub(tk) * lane(d_k) * cb      # k, v tiles
                  + sub(d_k) * lane(d_model) * cb     # Wo[h]
                  + sub(1) * lane(d_model) * 4        # bo
                  + sub(tq) * lane(d_model) * ob)     # output tile
    scratch = (2 * sub(tq) * lane(1)                  # m, l
               + sub(tq) * lane(d_k)                  # PV accumulator
               + sub(tq) * lane(d_model)) * 4         # out-proj accumulator
    score_ws = 2 * sub(tq) * lane(tk) * 4             # s / p working set
    total = int((blocks + scratch + score_ws) * 1.5) + (2 << 20)
    return max(8 << 20, min(total, 48 << 20))


def multi_head_self_attention(x, wq, bq, wk, bk, wv, bv, wo, bo, *, n_heads,
                              compute_dtype=None):
    """Forward pass equivalent to the PyTorch MultiHeadSelfAttention in eval
    mode with mask=None.  Linear weights are (in_features, out_features),
    i.e. pre-transposed w.r.t. torch.nn.Linear, so y = x @ W + b.

    compute_dtype: MXU operand dtype (pass jnp.bfloat16 in production on
    v6e/v7x).  Softmax statistics and all accumulation remain float32.
    """
    B, S, D = x.shape
    H = n_heads
    assert D % H == 0, "d_model must be divisible by n_heads"
    d_k = D // H
    f32 = jnp.float32
    out_dtype = x.dtype
    cdt = jnp.dtype(compute_dtype) if compute_dtype is not None else x.dtype

    # ---- Fused Q/K/V projection: once per token, outside the kernel --------
    # One (B*S, D) @ (D, 3D) matmul at full MXU width; bias added in f32.
    w_qkv = jnp.concatenate([wq, wk, wv], axis=1).astype(cdt)        # (D, 3D)
    b_qkv = jnp.concatenate([bq, bk, bv], axis=0).astype(f32)        # (3D,)
    qkv = jnp.dot(x.astype(cdt), w_qkv, preferred_element_type=f32) + b_qkv
    qkv = qkv.reshape(B, S, 3, H, d_k)
    q = qkv[:, :, 0].transpose(0, 2, 1, 3) * (1.0 / math.sqrt(d_k))  # fold scale
    k = qkv[:, :, 1].transpose(0, 2, 1, 3)
    v = qkv[:, :, 2].transpose(0, 2, 1, 3)
    q, k, v = q.astype(cdt), k.astype(cdt), v.astype(cdt)            # (B,H,S,d_k)

    # Per-head output projection: Wo laid out (H, d_k, D) -> D on the lane
    # axis (no lane padding), d_k on sublanes.
    wo_h = wo.reshape(H, d_k, D).astype(cdt)
    bo_r = bo.reshape(1, D).astype(f32)

    TQ, TK = _pick_tiles(S, cdt)
    n_qt, n_kt = S // TQ, S // TK
    grid = (B, n_qt, H, n_kt)

    in_specs = [
        pl.BlockSpec((1, 1, TQ, d_k), lambda b, qi, h, kv: (b, h, qi, 0)),  # q
        pl.BlockSpec((1, 1, TK, d_k), lambda b, qi, h, kv: (b, h, kv, 0)),  # k
        pl.BlockSpec((1, 1, TK, d_k), lambda b, qi, h, kv: (b, h, kv, 0)),  # v
        pl.BlockSpec((1, d_k, D),     lambda b, qi, h, kv: (h, 0, 0)),      # Wo[h]
        pl.BlockSpec((1, D),          lambda b, qi, h, kv: (0, 0)),         # bo
    ]
    out_spec = pl.BlockSpec((1, TQ, D), lambda b, qi, h, kv: (b, qi, 0))

    scratch_shapes = [
        pltpu.VMEM((TQ, 1), f32),      # m  (running max)
        pltpu.VMEM((TQ, 1), f32),      # l  (running denom)
        pltpu.VMEM((TQ, d_k), f32),    # PV accumulator (current head)
        pltpu.VMEM((TQ, D), f32),      # output-projection accumulator
    ]

    return pl.pallas_call(
        flash_mhsa_kernel,
        out_shape=jax.ShapeDtypeStruct((B, S, D), out_dtype),
        grid_spec=pltpu.PrefetchScalarGridSpec(
            num_scalar_prefetch=0,
            grid=grid,
            in_specs=in_specs,
            out_specs=out_spec,
            scratch_shapes=scratch_shapes),
        compiler_params=pltpu.CompilerParams(
            # B and query tiles are independent (shard across v7x's 2 TCs);
            # heads / kv tiles accumulate into VMEM scratch -> "arbitrary".
            dimension_semantics=("parallel", "parallel", "arbitrary", "arbitrary"),
            vmem_limit_bytes=_vmem_limit_bytes(TQ, TK, d_k, D, cdt, out_dtype)),
    )(q, k, v, wo_h, bo_r)


def _reference(x, wq, bq, wk, bk, wv, bv, wo, bo, n_heads):
    B, S, D = x.shape
    d_k = D // n_heads
    q = x @ wq + bq
    k = x @ wk + bk
    v = x @ wv + bv
    q = q.reshape(B, S, n_heads, d_k).transpose(0, 2, 1, 3)
    k = k.reshape(B, S, n_heads, d_k).transpose(0, 2, 1, 3)
    v = v.reshape(B, S, n_heads, d_k).transpose(0, 2, 1, 3)
    scores = jnp.einsum("bhqd,bhkd->bhqk", q, k) / math.sqrt(d_k)
    attn = jax.nn.softmax(scores, axis=-1)
    out = jnp.einsum("bhqk,bhkd->bhqd", attn, v)
    out = out.transpose(0, 2, 1, 3).reshape(B, S, D)
    return out @ wo + bo


if __name__ == "__main__":
    B, S, D, H = 2, 8, 32, 4

    key = jax.random.PRNGKey(0)
    keys = jax.random.split(key, 9)
    bound = 1.0 / math.sqrt(D)  # torch.nn.Linear default init range

    x = jax.random.normal(keys[0], (B, S, D), dtype=jnp.float32)
    # Weights stored directly as (in_features, out_features).
    wq = jax.random.uniform(keys[1], (D, D), jnp.float32, -bound, bound)
    wk = jax.random.uniform(keys[2], (D, D), jnp.float32, -bound, bound)
    wv = jax.random.uniform(keys[3], (D, D), jnp.float32, -bound, bound)
    wo = jax.random.uniform(keys[4], (D, D), jnp.float32, -bound, bound)
    bq = jax.random.uniform(keys[5], (D,), jnp.float32, -bound, bound)
    bk = jax.random.uniform(keys[6], (D,), jnp.float32, -bound, bound)
    bv = jax.random.uniform(keys[7], (D,), jnp.float32, -bound, bound)
    bo = jax.random.uniform(keys[8], (D,), jnp.float32, -bound, bound)

    ref = _reference(x, wq, bq, wk, bk, wv, bv, wo, bo, H)

    # Float32 operand path (matches the PyTorch module's f32 math closely).
    out = multi_head_self_attention(x, wq, bq, wk, bk, wv, bv, wo, bo,
                                    n_heads=H)
    out = jax.block_until_ready(out)
    assert out.shape == (B, S, D)
    assert jnp.allclose(out, ref, atol=2e-3, rtol=2e-3), "f32 mismatch vs ref"

    # Production path (v6e/v7x): bf16 MXU operands, f32 statistics/accumulate.
    out_bf16 = multi_head_self_attention(x, wq, bq, wk, bk, wv, bv, wo, bo,
                                         n_heads=H, compute_dtype=jnp.bfloat16)
    out_bf16 = jax.block_until_ready(out_bf16)
    assert out_bf16.shape == (B, S, D)
    assert jnp.allclose(out_bf16, ref, atol=5e-2, rtol=5e-2), "bf16 mismatch vs ref"

    print("KERNEL_OK")
</pallas_src>

<mosaic_0001>
module attributes {stable_mosaic.version = 11 : i64} {
  func.func @flash_mhsa_kernel(%arg0: i32, %arg1: i32, %arg2: i32, %arg3: i32, %arg4: memref<1x1x8x8xf32, #tpu.memory_space<vmem>>, %arg5: memref<1x1x8x8xf32, #tpu.memory_space<vmem>>, %arg6: memref<1x1x8x8xf32, #tpu.memory_space<vmem>>, %arg7: memref<1x8x32xf32, #tpu.memory_space<vmem>>, %arg8: memref<1x32xf32, #tpu.memory_space<vmem>>, %arg9: memref<1x8x32xf32, #tpu.memory_space<vmem>>, %arg10: memref<8x1xf32, #tpu.memory_space<vmem>>, %arg11: memref<8x1xf32, #tpu.memory_space<vmem>>, %arg12: memref<8x8xf32, #tpu.memory_space<vmem>>, %arg13: memref<8x32xf32, #tpu.memory_space<vmem>>) attributes {dimension_semantics = [#tpu.dimension_semantics<parallel>, #tpu.dimension_semantics<parallel>, #tpu.dimension_semantics<arbitrary>, #tpu.dimension_semantics<arbitrary>], iteration_bounds = array<i64: 2, 1, 4, 1>, scalar_prefetch = 0 : i64, scratch_operands = 4 : i64, tpu.core_type = #tpu.core_type<tc>, window_params = [{transform_indices = @transform_0, window_bounds = array<i64: 1, 1, 8, 8>}, {transform_indices = @transform_1, window_bounds = array<i64: 1, 1, 8, 8>}, {transform_indices = @transform_2, window_bounds = array<i64: 1, 1, 8, 8>}, {transform_indices = @transform_3, window_bounds = array<i64: 1, 8, 32>}, {pipeline_mode = #tpu.pipeline_mode<synchronous>, transform_indices = @transform_4, window_bounds = array<i64: 1, 32>}, {transform_indices = @transform_5, window_bounds = array<i64: 1, 8, 32>}]} {
    %c0_i32 = arith.constant 0 : i32
    %0 = arith.cmpi eq, %arg2, %c0_i32 : i32
    %c0_i32_0 = arith.constant 0 : i32
    %1 = arith.cmpi eq, %arg3, %c0_i32_0 : i32
    %2 = arith.andi %0, %1 : i1
    %3 = arith.extui %2 : i1 to i32
    %c0_i32_1 = arith.constant 0 : i32
    %4 = arith.cmpi ne, %3, %c0_i32_1 : i32
    scf.if %4 {
      %cst_34 = arith.constant 0.000000e+00 : f32
      %45 = vector.broadcast %cst_34 : f32 to vector<8x32xf32>
      %c0_35 = arith.constant 0 : index
      %c0_36 = arith.constant 0 : index
      %46 = vector.load %arg13[%c0_35, %c0_36] : memref<8x32xf32, #tpu.memory_space<vmem>>, vector<8x32xf32>
      tpu.vector_store %arg13[%c0_35, %c0_36], %45 {strides = array<i32>} : memref<8x32xf32, #tpu.memory_space<vmem>>, vector<8x32xf32>,
    } else {
    }
    %c0_i32_2 = arith.constant 0 : i32
    %5 = arith.cmpi eq, %arg3, %c0_i32_2 : i32
    %6 = arith.extui %5 : i1 to i32
    %c0_i32_3 = arith.constant 0 : i32
    %7 = arith.cmpi ne, %6, %c0_i32_3 : i32
    scf.if %7 {
      %cst_34 = arith.constant 0xFF800000 : f32
      %45 = vector.broadcast %cst_34 : f32 to vector<8x1xf32>
      %c0_35 = arith.constant 0 : index
      %c0_36 = arith.constant 0 : index
      %46 = vector.load %arg10[%c0_35, %c0_36] : memref<8x1xf32, #tpu.memory_space<vmem>>, vector<8x1xf32>
      tpu.vector_store %arg10[%c0_35, %c0_36], %45 {strides = array<i32>} : memref<8x1xf32, #tpu.memory_space<vmem>>, vector<8x1xf32>,
      %cst_37 = arith.constant 0.000000e+00 : f32
      %47 = vector.broadcast %cst_37 : f32 to vector<8x1xf32>
      %c0_38 = arith.constant 0 : index
      %c0_39 = arith.constant 0 : index
      %48 = vector.load %arg11[%c0_38, %c0_39] : memref<8x1xf32, #tpu.memory_space<vmem>>, vector<8x1xf32>
      tpu.vector_store %arg11[%c0_38, %c0_39], %47 {strides = array<i32>} : memref<8x1xf32, #tpu.memory_space<vmem>>, vector<8x1xf32>,
      %cst_40 = arith.constant 0.000000e+00 : f32
      %49 = vector.broadcast %cst_40 : f32 to vector<8x8xf32>
      %c0_41 = arith.constant 0 : index
      %c0_42 = arith.constant 0 : index
      %50 = vector.load %arg12[%c0_41, %c0_42] : memref<8x8xf32, #tpu.memory_space<vmem>>, vector<8x8xf32>
      tpu.vector_store %arg12[%c0_41, %c0_42], %49 {strides = array<i32>} : memref<8x8xf32, #tpu.memory_space<vmem>>, vector<8x8xf32>,
    } else {
    }
    %c0 = arith.constant 0 : index
    %c0_4 = arith.constant 0 : index
    %c0_5 = arith.constant 0 : index
    %c0_6 = arith.constant 0 : index
    %8 = vector.load %arg4[%c0, %c0_4, %c0_5, %c0_6] : memref<1x1x8x8xf32, #tpu.memory_space<vmem>>, vector<1x1x8x8xf32>
    %9 = vector.shape_cast %8 : vector<1x1x8x8xf32> to vector<8x8xf32>
    %c0_7 = arith.constant 0 : index
    %c0_8 = arith.constant 0 : index
    %c0_9 = arith.constant 0 : index
    %c0_10 = arith.constant 0 : index
    %10 = vector.load %arg5[%c0_7, %c0_8, %c0_9, %c0_10] : memref<1x1x8x8xf32, #tpu.memory_space<vmem>>, vector<1x1x8x8xf32>
    %11 = vector.shape_cast %10 : vector<1x1x8x8xf32> to vector<8x8xf32>
    %c0_11 = arith.constant 0 : index
    %c0_12 = arith.constant 0 : index
    %c0_13 = arith.constant 0 : index
    %c0_14 = arith.constant 0 : index
    %12 = vector.load %arg6[%c0_11, %c0_12, %c0_13, %c0_14] : memref<1x1x8x8xf32, #tpu.memory_space<vmem>>, vector<1x1x8x8xf32>
    %13 = vector.shape_cast %12 : vector<1x1x8x8xf32> to vector<8x8xf32>
    %cst = arith.constant dense<0.000000e+00> : vector<8x8xf32>
    %14 = tpu.matmul %9, %11, %cst {dimension_numbers = #tpu.dot_dimension_numbers<[1], [1], [0], [0], [0, 0, 1, 0], [], []>} : vector<8x8xf32>, vector<8x8xf32>, vector<8x8xf32> -> vector<8x8xf32>
    %c0_15 = arith.constant 0 : index
    %c0_16 = arith.constant 0 : index
    %15 = vector.load %arg10[%c0_15, %c0_16] : memref<8x1xf32, #tpu.memory_space<vmem>>, vector<8x1xf32>
    %cst_17 = arith.constant dense<0xFF800000> : vector<8xf32>
    %16 = vector.multi_reduction <maximumf>, %14, %cst_17 [1] : vector<8x8xf32> to vector<8xf32>
    %17 = vector.shape_cast %16 : vector<8xf32> to vector<8x1xf32>
    %18 = arith.maximumf %15, %17 : vector<8x1xf32>
    %19 = arith.subf %15, %18 : vector<8x1xf32>
    %20 = math.exp %19 : vector<8x1xf32>
    %21 = vector.broadcast %18 : vector<8x1xf32> to vector<8x8xf32>
    %22 = arith.subf %14, %21 : vector<8x8xf32>
    %23 = math.exp %22 : vector<8x8xf32>
    %c0_18 = arith.constant 0 : index
    %c0_19 = arith.constant 0 : index
    %24 = vector.load %arg11[%c0_18, %c0_19] : memref<8x1xf32, #tpu.memory_space<vmem>>, vector<8x1xf32>
    %25 = arith.mulf %20, %24 : vector<8x1xf32>
    %cst_20 = arith.constant dense<0.000000e+00> : vector<8xf32>
    %26 = vector.multi_reduction <add>, %23, %cst_20 [1] : vector<8x8xf32> to vector<8xf32>
    %27 = vector.shape_cast %26 : vector<8xf32> to vector<8x1xf32>
    %28 = arith.addf %25, %27 : vector<8x1xf32>
    %c0_21 = arith.constant 0 : index
    %c0_22 = arith.constant 0 : index
    %29 = vector.load %arg11[%c0_21, %c0_22] : memref<8x1xf32, #tpu.memory_space<vmem>>, vector<8x1xf32>
    tpu.vector_store %arg11[%c0_21, %c0_22], %28 {strides = array<i32>} : memref<8x1xf32, #tpu.memory_space<vmem>>, vector<8x1xf32>,
    %c0_23 = arith.constant 0 : index
    %c0_24 = arith.constant 0 : index
    %30 = vector.load %arg12[%c0_23, %c0_24] : memref<8x8xf32, #tpu.memory_space<vmem>>, vector<8x8xf32>
    %31 = vector.broadcast %20 : vector<8x1xf32> to vector<8x8xf32>
    %32 = arith.mulf %31, %30 : vector<8x8xf32>
    %cst_25 = arith.constant dense<0.000000e+00> : vector<8x8xf32>
    %33 = tpu.matmul %23, %13, %cst_25 {dimension_numbers = #tpu.dot_dimension_numbers<[1], [0], [0], [1], [0, 0, 1, 1], [], []>} : vector<8x8xf32>, vector<8x8xf32>, vector<8x8xf32> -> vector<8x8xf32>
    %34 = arith.addf %32, %33 : vector<8x8xf32>
    %c0_26 = arith.constant 0 : index
    %c0_27 = arith.constant 0 : index
    %35 = vector.load %arg12[%c0_26, %c0_27] : memref<8x8xf32, #tpu.memory_space<vmem>>, vector<8x8xf32>
    tpu.vector_store %arg12[%c0_26, %c0_27], %34 {strides = array<i32>} : memref<8x8xf32, #tpu.memory_space<vmem>>, vector<8x8xf32>,
    %c0_28 = arith.constant 0 : index
    %c0_29 = arith.constant 0 : index
    %36 = vector.load %arg10[%c0_28, %c0_29] : memref<8x1xf32, #tpu.memory_space<vmem>>, vector<8x1xf32>
    tpu.vector_store %arg10[%c0_28, %c0_29], %18 {strides = array<i32>} : memref<8x1xf32, #tpu.memory_space<vmem>>, vector<8x1xf32>,
    %c0_i32_30 = arith.constant 0 : i32
    %37 = arith.cmpi eq, %arg3, %c0_i32_30 : i32
    %38 = arith.extui %37 : i1 to i32
    %c0_i32_31 = arith.constant 0 : i32
    %39 = arith.cmpi ne, %38, %c0_i32_31 : i32
    scf.if %39 {
      %c0_34 = arith.constant 0 : index
      %c0_35 = arith.constant 0 : index
      %45 = vector.load %arg12[%c0_34, %c0_35] : memref<8x8xf32, #tpu.memory_space<vmem>>, vector<8x8xf32>
      %c0_36 = arith.constant 0 : index
      %c0_37 = arith.constant 0 : index
      %46 = vector.load %arg11[%c0_36, %c0_37] : memref<8x1xf32, #tpu.memory_space<vmem>>, vector<8x1xf32>
      %47 = tpu.reciprocal %46 : vector<8x1xf32> -> vector<8x1xf32>
      %48 = vector.broadcast %47 : vector<8x1xf32> to vector<8x8xf32>
      %49 = arith.mulf %45, %48 : vector<8x8xf32>
      %c0_38 = arith.constant 0 : index
      %c0_39 = arith.constant 0 : index
      %50 = vector.load %arg13[%c0_38, %c0_39] : memref<8x32xf32, #tpu.memory_space<vmem>>, vector<8x32xf32>
      %c0_40 = arith.constant 0 : index
      %c0_41 = arith.constant 0 : index
      %c0_42 = arith.constant 0 : index
      %51 = vector.load %arg7[%c0_40, %c0_41, %c0_42] : memref<1x8x32xf32, #tpu.memory_space<vmem>>, vector<1x8x32xf32>
      %52 = vector.shape_cast %51 : vector<1x8x32xf32> to vector<8x32xf32>
      %cst_43 = arith.constant dense<0.000000e+00> : vector<8x32xf32>
      %53 = tpu.matmul %49, %52, %cst_43 {dimension_numbers = #tpu.dot_dimension_numbers<[1], [0], [0], [1], [0, 0, 1, 1], [], []>} : vector<8x8xf32>, vector<8x32xf32>, vector<8x32xf32> -> vector<8x32xf32>
      %54 = arith.addf %50, %53 : vector<8x32xf32>
      %c0_44 = arith.constant 0 : index
      %c0_45 = arith.constant 0 : index
      %55 = vector.load %arg13[%c0_44, %c0_45] : memref<8x32xf32, #tpu.memory_space<vmem>>, vector<8x32xf32>
      tpu.vector_store %arg13[%c0_44, %c0_45], %54 {strides = array<i32>} : memref<8x32xf32, #tpu.memory_space<vmem>>, vector<8x32xf32>,
    } else {
    }
    %c3_i32 = arith.constant 3 : i32
    %40 = arith.cmpi eq, %arg2, %c3_i32 : i32
    %c0_i32_32 = arith.constant 0 : i32
    %41 = arith.cmpi eq, %arg3, %c0_i32_32 : i32
    %42 = arith.andi %40, %41 : i1
    %43 = arith.extui %42 : i1 to i32
    %c0_i32_33 = arith.constant 0 : i32
    %44 = arith.cmpi ne, %43, %c0_i32_33 : i32
    scf.if %44 {
      %c0_34 = arith.constant 0 : index
      %c0_35 = arith.constant 0 : index
      %45 = vector.load %arg13[%c0_34, %c0_35] : memref<8x32xf32, #tpu.memory_space<vmem>>, vector<8x32xf32>
      %c0_36 = arith.constant 0 : index
      %c0_37 = arith.constant 0 : index
      %46 = vector.load %arg8[%c0_36, %c0_37] : memref<1x32xf32, #tpu.memory_space<vmem>>, vector<1x32xf32>
      %47 = vector.broadcast %46 : vector<1x32xf32> to vector<8x32xf32>
      %48 = arith.addf %45, %47 : vector<8x32xf32>
      %c0_38 = arith.constant 0 : index
      %c0_39 = arith.constant 0 : index
      %c0_40 = arith.constant 0 : index
      %49 = vector.load %arg9[%c0_38, %c0_39, %c0_40] : memref<1x8x32xf32, #tpu.memory_space<vmem>>, vector<1x8x32xf32>
      %50 = vector.shape_cast %49 : vector<1x8x32xf32> to vector<8x32xf32>
      %51 = vector.shape_cast %48 : vector<8x32xf32> to vector<1x8x32xf32>
      tpu.vector_store %arg9[%c0_38, %c0_39, %c0_40], %51 {strides = array<i32>} : memref<1x8x32xf32, #tpu.memory_space<vmem>>, vector<1x8x32xf32>,
    } else {
    }
    return
  }
  func.func @transform_0(%arg0: i32, %arg1: i32, %arg2: i32, %arg3: i32) -> (i32, i32, i32, i32) {
    %c0_i32 = arith.constant 0 : i32
    %c0_i32_0 = arith.constant 0 : i32
    return %arg0, %arg2, %arg1, %c0_i32 : i32, i32, i32, i32
  }
  func.func @transform_1(%arg0: i32, %arg1: i32, %arg2: i32, %arg3: i32) -> (i32, i32, i32, i32) {
    %c0_i32 = arith.constant 0 : i32
    %c0_i32_0 = arith.constant 0 : i32
    return %arg0, %arg2, %arg3, %c0_i32 : i32, i32, i32, i32
  }
  func.func @transform_2(%arg0: i32, %arg1: i32, %arg2: i32, %arg3: i32) -> (i32, i32, i32, i32) {
    %c0_i32 = arith.constant 0 : i32
    %c0_i32_0 = arith.constant 0 : i32
    return %arg0, %arg2, %arg3, %c0_i32 : i32, i32, i32, i32
  }
  func.func @transform_3(%arg0: i32, %arg1: i32, %arg2: i32, %arg3: i32) -> (i32, i32, i32) {
    %c0_i32 = arith.constant 0 : i32
    %c0_i32_0 = arith.constant 0 : i32
    %c0_i32_1 = arith.constant 0 : i32
    return %arg2, %c0_i32, %c0_i32_0 : i32, i32, i32
  }
  func.func @transform_4(%arg0: i32, %arg1: i32, %arg2: i32, %arg3: i32) -> (i32, i32) {
    %c0_i32 = arith.constant 0 : i32
    %c0_i32_0 = arith.constant 0 : i32
    %c0_i32_1 = arith.constant 0 : i32
    return %c0_i32, %c0_i32_0 : i32, i32
  }
  func.func @transform_5(%arg0: i32, %arg1: i32, %arg2: i32, %arg3: i32) -> (i32, i32, i32) {
    %c0_i32 = arith.constant 0 : i32
    %c0_i32_0 = arith.constant 0 : i32
    return %arg0, %arg1, %c0_i32 : i32, i32, i32
  }
}

</mosaic_0001>

<bundles_post_ra>
// kernel: tpu_custom_call.1
= control target key start
LH: loop header
LB: loop body
LE: loop exit
PB: predicated region body
PF: predicated region fallthrough
CT: control target
= control target key end

     0   :  { %s1847_s0 = inlined_call_operand.hbm [shape: f32[2,4,8,8], index: 0, kind: input, shape index: {}]   ;;  %s1848_s1 = inlined_call_operand.hbm [shape: f32[2,4,8,8], index: 1, kind: input, shape index: {}]   ;;  %s1849_s2 = inlined_call_operand.hbm [shape: f32[2,4,8,8], index: 2, kind: input, shape index: {}]   ;;  %s1850_s3 = inlined_call_operand.hbm [shape: f32[4,8,32], index: 3, kind: input, shape index: {}]   ;;  %s1851_s4 = inlined_call_operand.vmem [shape: f32[1,32], index: 4, kind: input, shape index: {}]   ;;  %s1852_s5 = inlined_call_operand.hbm [shape: f32[2,8,32], index: 5, kind: output, shape index: {}]  }
   0x1   :  { %1871 = sst [smem:[#allocation31_spill]] %s1848_s1 }
   0x2   :  { %1872 = sst [smem:[#allocation32_spill]] %s1851_s4 }
   0x3   :  { %1873 = sst [smem:[#allocation33_spill]] %s1852_s5 }
   0x4   :  { %10 = vsyncpa [#allocation7], 0 }
   0x5   :  { %12 = vsyncpa [#allocation7 + $0x1], 0 }
   0x6   :  { %13 = vsyncpa [#allocation10], 0 }
   0x7   :  { %15 = vsyncpa [#allocation10 + $0x1], 0 }
   0x8   :  { %16 = vsyncpa [#allocation13], 0 }
   0x9   :  { %18 = vsyncpa [#allocation13 + $0x1], 0 }
   0xa   :  { %19 = vsyncpa [#allocation8], 0 }
   0xb   :  { %21 = vsyncpa [#allocation8 + $0x1], 0  ;;  %s1409_s18 = smov 0   ;;  %s1411_s19 = smov 0  }
   0xc   :  { %s1413_s20 = smov 0   ;;  %s1415_s21 = smov 0  }
   0xd   :  { %s1417_s22 = smov 0   ;;  %s1419_s23 = smov 0  }
   0xe   :  { %s1421_s24 = smov 0   ;;  %s1423_s25 = smov 0  }
   0xf   :  { %s1425_s26 = smov 0   ;;  %s1427_s27 = smov 0  }
  0x10   :  { %s1429_s28 = smov 0   ;;  %s1431_s29 = smov 0  }
  0x11   :  { %s1433_s30 = smov 0   ;;  %s1435_s6 = smov 0  }
  0x12 LB: > { %1874 = sst [smem:[#allocation19_spill]] %s1315_s18  ;;  %s1478_s7 = sadd.s32 4294967295, %s1367_s6   ;;  %s1367_s6 = sphi %s1435_s6, %s27_s6   ;;  %s1363_s30 = sphi %s1433_s30, %s1935_s30   ;;  %s1359_s29 = sphi %s1431_s29, %s1934_s29   ;;  %s1355_s28 = sphi %s1429_s28, %s1922_s28   ;;  %s1351_s27 = sphi %s1427_s27, %s1933_s27   ;;  %s1347_s26 = sphi %s1425_s26, %s1921_s26   ;;  %s1343_s25 = sphi %s1423_s25, %s1932_s25   ;;  %s1339_s24 = sphi %s1421_s24, %s1931_s24   ;;  %s1335_s23 = sphi %s1419_s23, %s1930_s23   ;;  %s1331_s22 = sphi %s1417_s22, %s1929_s22   ;;  %s1327_s21 = sphi %s1415_s21, %s1928_s21   ;;  %s1323_s20 = sphi %s1413_s20, %s1919_s20   ;;  %s1319_s19 = sphi %s1411_s19, %s1927_s19   ;;  %s1315_s18 = sphi %s1409_s18, %s1926_s18  }
  0x13   : > { %1875 = sst [smem:[#allocation20_spill]] %s1323_s20  ;;  %s885_s8 = sadd.s32 4294967294, %s1367_s6  }
  0x14   : > { %1876 = sst [smem:[#allocation21_spill]] %s1347_s26  ;;  %s45_s9 = sadd.s32 1, %s1359_s29 }
  0x15   : > { %1877 = sst [smem:[#allocation22_spill]] %s1351_s27  ;;  %s53_s10 = sadd.s32 1, %s1363_s30 }
  0x16   : > { %1878 = sst [smem:[#allocation23_spill]] %s1355_s28  ;;  %p47_p0 = scmp.ge.s32.totalorder %s45_s9, 4 }
  0x17   : > { %1879 = sst [smem:[#allocation24_spill]] %s1363_s30  ;;  %s64_s11 = sadd.s32 1, %s1347_s26 }
  0x18   : > { %p71_p1 = scmp.ne.s32.totalorder %s1347_s26, %s1343_s25  ;;  %p1865_p2 = scmp.eq.s32.totalorder %s1367_s6, 0 }
  0x19   : > { %s1937_s9 = smov (%p47_p0, %s45_s9), 0  ;;  %s1939_s10 = smov (!%p47_p0, %s53_s10), %s1363_s30 }
  0x1a   : > { %1880 = sst [smem:[#allocation25_spill]] %s1937_s9  ;;  %s1492_s12 = ssub.s32 %s1359_s29, %s1937_s9 }
  0x1b   : > { %p1496_p3 = por %p1865_p2, %p71_p1  ;;  %p55_p4 = scmp.ge.s32.totalorder %s1939_s10, 2 }
  0x1c   : > { %p77_p5 = scmp.ne.s32.totalorder %s1343_s25, %s1339_s24  ;;  %p1864_p6 = scmp.eq.s32.totalorder %s1478_s7, 0 }
  0x1d   : > { %s1941_s10 = smov (%p55_p4, %s1939_s10), 0  ;;  %s199_s15 = sadd.s32 1, %s1323_s20 }
  0x1e   : > { %1882 = sst [smem:[#allocation26_spill]] %s1941_s10  ;;  %p1507_p8 = por %p1864_p6, %p77_p5 }
  0x1f   : > { %s57_s16 = ssub.s32 %s1363_s30, %s1941_s10  ;;  %p209_p9 = scmp.ne.s32.totalorder %s1323_s20, %s1319_s19 }
  0x20   : > { %s1883_s14 = scalar_select %p1507_p8, 1, 0 }
  0x21   : > { %s59_s17 = sor.u32 %s1492_s12, %s57_s16  ;;  %p197_p10 = scmp.eq.s32.totalorder %s57_s16, 0 }
  0x22   : > { %p62_p11 = scmp.eq.s32.totalorder %s59_s17, 0  ;;  %p210_p12 = scmp.eq.s32.totalorder %s1478_s7, 7 }
  0x23   : > { %s1519_s24 = scalar_select %p197_p10, %s1323_s20, %s199_s15  }
  0x24   : > { %s1522_s9 = scalar_select %p62_p11, %s1347_s26, %s64_s11  }
  0x25   : > { %1884 = sst [smem:[#allocation27_spill]] %s1519_s24  ;;  %p1524_p13 = por %p210_p12, %p209_p9 }
  0x26   : > { %1885 = sst [smem:[#allocation28_spill]] %s1522_s9  ;;  %p215_p0 = scmp.ne.s32.totalorder %s1319_s19, %s1315_s18 }
  0x27   : > { %s1886_s5 = scalar_select %p1524_p13, 1, 0 }
  0x28   : > { %p216_p1 = scmp.eq.s32.totalorder %s885_s8, 7  ;;  %p1863_p4 = scmp.lt.s32.totalorder %s1367_s6, 8 }
  0x29   : > { %1887 = sst [smem:[#allocation29_spill]] %s1886_s5  ;;  %s1858_s10 = sand.u32 1, %s1347_s26  }
  0x2a   : > { %p1532_p5 = por %p216_p1, %p215_p0  ;;  %s1538_s16 = sshll.u32 %s1858_s10, 3 }
  0x2b   : > { %s889_s15 = sshll.u32 %s1363_s30, 2  ;;  %p1545_p9 = pnand %p1863_p4, %p1496_p3 }
  0x2c   : > { %s1888_s28 = scalar_select %p1532_p5, 1, 0 }
  0x2d   : > { %s1890_s11 = scalar_select %p1545_p9, 1, 0 }
  0x2e   : > { %1889 = sst [smem:[#allocation30_spill]] %s1888_s28  ;;  %s249_s17 = sadd.s32 %s1359_s29, %s889_s15 }
  0x2f   : > { %s260_s8 = sand.u32 1, %s1367_s6   ;;  %s1551_s9 = sshll.u32 %s249_s17, 7 }
  0x30   : > { %s1891_s1 = sld [smem:[#allocation31_spill]]  ;;  %s264_s13 = scalar_lea.vmem [#allocation9], %s1538_s16 }
  0x31   : > { %s274_s10 = sshll.u32 %s264_s13, 4  ;;  %s1563_s30 = scalar_lea.sflag [#allocation10], %s260_s8  ;;  %s1560_s10 = int_to_ptr.vmem [resolvable:$true] %s274_s10 }
  0x32   : > { %p1569_p11 = pneg %p1545_p9 }
  0x36   : > { %s1557_s28 = scalar_lea.hbm %s1891_s1, %s1551_s9  ;;  %s1098_s13 = scalar_lea.hbm %s1891_s1, 1024 }
  0x37   : > { %s1093_s15 = scalar_lea.hbm %s1557_s28, 128  ;;  %p1099_p1 = scmp.lt.u32.totalorder %s1557_s28, %s1891_s1 }
  0x38   : > { %p1094_p10 = scmp.ne.s32.totalorder %s1557_s28, %s1093_s15  ;;  %p1100_p4 = scmp.lt.u32.totalorder %s1098_s13, %s1093_s15 }
  0x39   : > { %p1102_p2 = scmp.lt.u32.totalorder %s1093_s15, %s1557_s28 }
  0x3a   : > { %p1096_p12 = pnand %p1569_p11, %p1094_p10  ;;  %p1101_p6 = por %p1100_p4, %p1099_p1 }
  0x3c   : > { %p1097_p0 = pneg %p1096_p12  ;;  %p1103_p7 = por %p1102_p2, %p1101_p6 }
  0x3e   : > { %p1104_p3 = pnand %p1103_p7, %p1097_p0 }
  0x40   : > { %1107 = shalt.err (!%p1104_p3)
}
  0x41   : > { %s1108_s8 = scalar_lea.vmem %s1560_s10, 128  ;;  %s1369_s20 = smov [#allocation9]  }
  0x42   : > { %p1109_p10 = scmp.ne.s32.totalorder %s1560_s10, %s1108_s8  ;;  %s1113_s24 = sshll.u32 %s1369_s20, 4  ;;  %s1114_s24 = int_to_ptr.vmem [resolvable:$false] %s1113_s24 }
  0x43   : > { %s1115_s5 = scalar_lea.vmem %s1114_s24, 256  ;;  %p1116_p13 = scmp.lt.s32.totalorder %s1560_s10, %s1114_s24 }
  0x44   : > { %p1111_p12 = pnand %p1109_p10, %p1569_p11  ;;  %p1117_p8 = scmp.lt.s32.totalorder %s1115_s5, %s1108_s8 }
  0x46   : > { %p1112_p5 = pneg %p1111_p12  ;;  %p1118_p4 = por %p1117_p8, %p1116_p13 }
  0x48   : > { %p1119_p1 = pnand %p1118_p4, %p1112_p5 }
  0x4a   : > { %1122 = shalt.err (!%p1119_p1)
}
  0x4b   : > { %955 = dma.hbm_to_vmem [thread:$0]  (!%p1545_p9), %s1557_s28, 128, %s1560_s10, %s1563_s30  }
  0x4c   : > { %p318_p2 = scmp.lt.s32.totalorder %s1367_s6, 9  ;;  %p1893_p6 = scmp.ge.s32.totalorder %s1367_s6, 1 }
  0x4d   : > { %s1604_s8 = scalar_lea.hbm %s1847_s0, %s1551_s9  ;;  %s243_s20 = scalar_lea.vmem [#allocation6], %s1538_s16 }
  0x4e   : > { %p1596_p7 = pnand %p1893_p6, %p318_p2  ;;  %s253_s24 = sshll.u32 %s243_s20, 4  ;;  %s254_s24 = int_to_ptr.vmem [resolvable:$true] %s253_s24 }
  0x4f   : > { %s1895_s5 = sand.u32 1, %s1347_s26   ;;  %s1123_s10 = scalar_lea.hbm %s1604_s8, 128 }
  0x50   : > { %s1894_s18 = scalar_select %p1596_p7, 1, 0 }
  0x51   : > { %s240_s28 = scalar_lea.sflag [#allocation7], %s1895_s5  ;;  %p1124_p8 = scmp.ne.s32.totalorder %s1604_s8, %s1123_s10 }
  0x52   : > { %s1128_s15 = scalar_lea.hbm %s1847_s0, 1024  ;;  %p1129_p3 = scmp.lt.u32.totalorder %s1604_s8, %s1847_s0 }
  0x53   : > { %p1126_p13 = pnand %p1124_p8, %p1569_p11  ;;  %p1130_p0 = scmp.lt.u32.totalorder %s1128_s15, %s1123_s10 }
  0x54   : > { %p1132_p12 = scmp.lt.u32.totalorder %s1123_s10, %s1604_s8 }
  0x55   : > { %p1127_p5 = pneg %p1126_p13  ;;  %p1131_p10 = por %p1130_p0, %p1129_p3 }
  0x57   : > { %p1133_p4 = por %p1132_p12, %p1131_p10 }
  0x59   : > { %p1134_p1 = pnand %p1133_p4, %p1127_p5 }
  0x5b   : > { %1137 = shalt.err (!%p1134_p1)
}
  0x5c   : > { %s1138_s20 = scalar_lea.vmem %s254_s24, 128  ;;  %s1370_s5 = smov [#allocation6]  }
  0x5d   : > { %p1139_p2 = scmp.ne.s32.totalorder %s254_s24, %s1138_s20  ;;  %s1143_s26 = sshll.u32 %s1370_s5, 4  ;;  %s1144_s26 = int_to_ptr.vmem [resolvable:$false] %s1143_s26 }
  0x5e   : > { %s1145_s1 = scalar_lea.vmem %s1144_s26, 256  ;;  %p1146_p13 = scmp.lt.s32.totalorder %s254_s24, %s1144_s26 }
  0x5f   : > { %p1141_p6 = pnand %p1139_p2, %p1569_p11  ;;  %p1147_p7 = scmp.lt.s32.totalorder %s1145_s1, %s1138_s20 }
  0x61   : > { %p1142_p8 = pneg %p1141_p6  ;;  %p1148_p9 = por %p1147_p7, %p1146_p13 }
  0x63   : > { %p1149_p0 = pnand %p1148_p9, %p1142_p8 }
  0x65   : > { %1152 = shalt.err (!%p1149_p0)
}
  0x66   : > { %p1896_p3 = scmp.ne.s32.totalorder %s1890_s11, 0  ;;  %s1630_s10 = scalar_lea.hbm %s1849_s2, %s1551_s9 }
  0x67   : > { %s285_s26 = scalar_lea.vmem [#allocation11], %s1538_s16  ;;  %s1153_s13 = scalar_lea.hbm %s1630_s10, 128 }
  0x68   : > { %952 = dma.hbm_to_vmem [thread:$0]  (!%p1896_p3), %s1604_s8, 128, %s254_s24, %s240_s28  }
  0x69   : > { %s295_s15 = sshll.u32 %s285_s26, 4  ;;  %p1154_p9 = scmp.ne.s32.totalorder %s1630_s10, %s1153_s13  ;;  %s296_s15 = int_to_ptr.vmem [resolvable:$true] %s295_s15 }
  0x6a   : > { %s1158_s8 = scalar_lea.hbm %s1849_s2, 1024  ;;  %p1159_p10 = scmp.lt.u32.totalorder %s1630_s10, %s1849_s2 }
  0x6b   : > { %p1156_p7 = pnand %p1154_p9, %p1569_p11  ;;  %p1160_p12 = scmp.lt.u32.totalorder %s1158_s8, %s1153_s13 }
  0x6c   : > { %p1162_p1 = scmp.lt.u32.totalorder %s1153_s13, %s1630_s10 }
  0x6d   : > { %p1157_p5 = pneg %p1156_p7  ;;  %p1161_p4 = por %p1160_p12, %p1159_p10 }
  0x6f   : > { %p1163_p2 = por %p1162_p1, %p1161_p4 }
  0x71   : > { %p1164_p6 = pnand %p1163_p2, %p1157_p5 }
  0x73   : > { %1167 = shalt.err (!%p1164_p6)
}
  0x74   : > { %s1168_s9 = scalar_lea.vmem %s296_s15, 128  ;;  %s1371_s16 = smov [#allocation11]  }
  0x75   : > { %p1169_p8 = scmp.ne.s32.totalorder %s296_s15, %s1168_s9  ;;  %s1173_s1 = sshll.u32 %s1371_s16, 4  ;;  %s1174_s1 = int_to_ptr.vmem [resolvable:$false] %s1173_s1 }
  0x76   : > { %s1175_s4 = scalar_lea.vmem %s1174_s1, 256  ;;  %p1176_p9 = scmp.lt.s32.totalorder %s296_s15, %s1174_s1 }
  0x77   : > { %p1171_p13 = pnand %p1169_p8, %p1569_p11  ;;  %p1177_p7 = scmp.lt.s32.totalorder %s1175_s4, %s1168_s9 }
  0x79   : > { %p1172_p0 = pneg %p1171_p13  ;;  %p1178_p3 = por %p1177_p7, %p1176_p9 }
  0x7b   : > { %p1179_p10 = pnand %p1178_p3, %p1172_p0 }
  0x7d   : > { %1182 = shalt.err (!%p1179_p10)
}
  0x7e   : > { %p1897_p12 = scmp.ne.s32.totalorder %s1890_s11, 0  ;;  %s150_s17 = sadd.s32 1, %s1335_s23 }
  0x7f   : > { %p1898_p11 = scmp.eq.s32.totalorder %s1492_s12, 0  ;;  %p157_p3 = scmp.ne.s32.totalorder %s1335_s23, %s1331_s22 }
  0x80   : > { %958 = dma.hbm_to_vmem [thread:$0]  (!%p1897_p12), %s1630_s10, 128, %s296_s15, %s1563_s30  }
  0x81   : > { %s1655_s27 = scalar_select %p1898_p11, %s1335_s23, %s150_s17  }
  0x82   : > { %p163_p5 = scmp.ne.s32.totalorder %s1331_s22, %s1327_s21  ;;  %s302_s11 = sand.u32 1, %s1335_s23  }
  0x83   : > { %s898_s26 = sshll.u32 %s1359_s29, 7  ;;  %p1899_p4 = scmp.eq.s32.totalorder %s1367_s6, 0 }
  0x84   : > { %p1900_p2 = scmp.eq.s32.totalorder %s1478_s7, 0  ;;  %s897_s20 = sshll.u32 %s302_s11, 3 }
  0x85   : > { %p159_p1 = por %p157_p3, %p1899_p4  ;;  %s1674_s30 = scalar_lea.hbm %s1850_s3, %s898_s26 }
  0x86   : > { %p1667_p6 = por %p163_p5, %p1900_p2  ;;  %s306_s21 = scalar_lea.vmem [#allocation12], %s897_s20 }
  0x87   : > { %s313_s12 = sshll.u32 %s306_s21, 4  ;;  %p1902_p8 = scmp.lt.s32.totalorder %s1367_s6, 8  ;;  %s1682_s12 = int_to_ptr.vmem [resolvable:$true] %s313_s12 }
  0x88   : > { %s303_s15 = scalar_lea.sflag [#allocation13], %s302_s11  ;;  %s1183_s24 = scalar_lea.hbm %s1674_s30, 128 }
  0x89   : > { %p1678_p13 = pnand %p1902_p8, %p159_p1  ;;  %p1184_p0 = scmp.ne.s32.totalorder %s1674_s30, %s1183_s24 }
  0x8a   : > { %s1188_s16 = scalar_lea.hbm %s1850_s3, 512  ;;  %p1189_p12 = scmp.lt.u32.totalorder %s1674_s30, %s1850_s3 }
  0x8b   : > { %p1185_p9 = pneg %p1678_p13  ;;  %p1190_p11 = scmp.lt.u32.totalorder %s1188_s16, %s1183_s24 }
  0x8c   : > { %p1192_p5 = scmp.lt.u32.totalorder %s1183_s24, %s1674_s30 }
  0x8d   : > { %p1186_p7 = pnand %p1185_p9, %p1184_p0  ;;  %p1191_p3 = por %p1190_p11, %p1189_p12 }
  0x8f   : > { %p1187_p10 = pneg %p1186_p7  ;;  %p1193_p4 = por %p1192_p5, %p1191_p3 }
  0x91   : > { %p1194_p1 = pnand %p1193_p4, %p1187_p10 }
  0x93   : > { %1197 = shalt.err (!%p1194_p1)
}
  0x94   : > { %s1198_s17 = scalar_lea.vmem %s1682_s12, 128  ;;  %s1372_s11 = smov [#allocation12]  }
  0x95   : > { %p1199_p2 = scmp.ne.s32.totalorder %s1682_s12, %s1198_s17  ;;  %s1203_s26 = sshll.u32 %s1372_s11, 4  ;;  %s1204_s26 = int_to_ptr.vmem [resolvable:$false] %s1203_s26 }
  0x96   : > { %s1205_s20 = scalar_lea.vmem %s1204_s26, 256  ;;  %p1206_p7 = scmp.lt.s32.totalorder %s1682_s12, %s1204_s26 }
  0x97   : > { %p1201_p8 = pnand %p1199_p2, %p1185_p9  ;;  %p1207_p12 = scmp.lt.s32.totalorder %s1205_s20, %s1198_s17 }
  0x99   : > { %p1202_p0 = pneg %p1201_p8  ;;  %p1208_p11 = por %p1207_p12, %p1206_p7 }
  0x9b   : > { %p1209_p3 = pnand %p1208_p11, %p1202_p0 }
  0x9d   : > { %1212 = shalt.err (!%p1209_p3)
}
  0x9e   : > { %961 = dma.hbm_to_vmem [thread:$0]  (!%p1678_p13), %s1674_s30, 128, %s1682_s12, %s303_s15  }
  0x9f   : > { %p1904_p10 = scmp.ne.s32.totalorder %s1894_s18, 0 }
  0xa0   : > { %s324_s5 = sand.u32 (!%p1904_p10), 1, %s1343_s25   ;;  %p1905_p9 = scmp.ne.s32.totalorder (!%p1904_p10), %s1883_s14, 0 }
  0xa1   : > { %322 = sbr.rel (%p1904_p10) target bundleno = 1242 (0x4da), region = 40  ;;  %s1712_s8 = sshll.u32 (!%p1904_p10), %s324_s5, 3 }
  0xa2   : > { %s325_s21 = scalar_lea.sflag (!%p1904_p10), [#allocation7], %s324_s5  ;;  %s328_s24 = scalar_lea.vmem (!%p1904_p10), [#allocation6], %s1712_s8 }
  0xa8   : > { %1298 = dma.done.wait (%p1905_p9), %s325_s21, 128  }
  0xa9   : > { %1300 = vsyncadd (%p1905_p9), %s325_s21, 4294967168  ;;  %s333_s30 = sand.u32 1, %s1478_s7   ;;  %s337_s18 = scalar_lea.vmem [#allocation9], %s1712_s8 }
  0xaa   : > { %s334_s12 = scalar_lea.sflag [#allocation10], %s333_s30 }
  0xab   : > { %1302 = dma.done.wait (%p1905_p9), %s334_s12, 256  }
  0xac   : > { %1304 = vsyncadd (%p1905_p9), %s334_s12, 4294967040  ;;  %s351_s10 = sand.u32 1, %s1331_s22   ;;  %s346_s28 = scalar_lea.vmem [#allocation11], %s1712_s8 }
  0xad   : > { %s1726_s15 = sshll.u32 %s351_s10, 3  ;;  %s352_s9 = scalar_lea.sflag [#allocation13], %s351_s10 }
  0xae   : > { %s355_s16 = scalar_lea.vmem [#allocation12], %s1726_s15 }
  0xaf   : > { %1306 = dma.done.wait (%p1667_p6), %s352_s9, 128  }
  0xb0   : > { %1308 = vsyncadd (%p1667_p6), %s352_s9, 4294967168  ;;  %s1906_s7 = sld [smem:[#allocation22_spill]]  ;;  %s394_s14 = sand.u32 1, %s1319_s19  }
  0xb1   : > { %s1738_s1 = sshll.u32 %s394_s14, 3 }
  0xb2   : > { %s396_s4 = scalar_lea.vmem [#allocation14], %s1738_s1 }
  0xb6   : > { %p397_p13 = scmp.eq.s32.totalorder %s1906_s7, 0 }
  0xb7   : > { %vm403_vm0 = vcmask (%p397_p13), 261120   ;;  %v1373_v0 = vmov (%p397_p13), 0.0  }
  0xb8   : > { %402 = sbr.rel (!%p397_p13) target bundleno = 191 (0xbf), region = 60  ;;  %404 = vst.msk [vmem:[#allocation5] sm:$0xff] (%p397_p13), %vm403_vm0, %v1373_v0 }
  0xbf PF: > { %vm411_vm1 = vcmask 64512   ;;  %v414_v1 = vld [vmem:[%s337_s18] sm:$0xff]  ;;  %v1374_v2 = vmov 0.0   ;;  %vm1375_vm2 = vmmov 0   ;;  %v413_v3 = vld [vmem:[%s328_s24] sm:$0xff]  ;;  %vm408_vm3 = vcmask 7168  }
  0xc0   : > { %924 = vmatprep.subr.mxu0 %v1374_v2  ;;  %412 = vst.msk [vmem:[#allocation4] sm:$0xff] %vm411_vm1, %v1374_v2  ;;  %926 = vmatprep.mubr.msk.f32.mxu0 %vm1375_vm2, %v1374_v2  ;;  %v1376_v7 = vmov -inf   ;;  %v1377_v8 = vmov 0   ;;  %v415_v13 = vld [vmem:[%s346_s28] sm:$0xff]  ;;  %v613_v21 = vld [vmem:[%s355_s16] sm:$0xff]  ;;  %s1907_s13 = sld [smem:[#allocation22_spill]] }
  0xc1   : > { %925 = vmatpush3.xpose.msk.msra.mxu0 %vm411_vm1, %v414_v1  ;;  %929 = vmatprep.subr.mxu1 %v1374_v2  ;;  %409 = vst.msk [vmem:[#allocation2] sm:$0xff] %vm408_vm3, %v1376_v7  ;;  %410 = vst.msk [vmem:[#allocation3] sm:$0xff] %vm408_vm3, %v1374_v2  ;;  %v612_v37 = vld [vmem:[#allocation5] sm:$0xff]  ;;  %vm688_vm4 = vcmask 261120  }
  0xc2   : > { %931 = vmatprep.mubr.msk.f32.mxu1 %vm1375_vm2, %v1374_v2  ;;  %1085 = vset.pattern.permute.xlu0 %v1377_v8 }
  0xc3   : > { %1086 = vset.pattern.permute.xlu1 %v1377_v8  ;;  %930 = vmatpush3.msra.mxu1 %v415_v13 }
  0xc4   : > { %927 = vmatmul.mubr.msk.f32.vlgmr.msra.gmra.mrb[0].mxu0 %vm411_vm1, %v413_v3  ;;  %934 = vmatprep.subr.mxu1 %v1374_v2 }
  0xc6   : > { %p690_p6 = scmp.eq.s32.totalorder %s1907_s13, 3 }
  0xc7   : > { %v517_v28 = vld [vmem:[#allocation4] sm:$0xff]  ;;  %s1908_s26 = sld [smem:[#allocation32_spill]] (%p690_p6) }
  0xc8   : > { %v493_v9 = vld [vmem:[#allocation2] sm:$0xff]  ;;  %v509_v22 = vld [vmem:[#allocation3] sm:$0xff] }
  0xcd   : > { %v911_v42 = vld [vmem:[%s1908_s26] ss:$0 sm:$0xff] (%p690_p6) }
 0x197   : > { %v489_v4 = vpop.f32.mrb[0].mxu0 }
 0x198   : > { %v928_v5 = vpop.f32.mrb[1].mxu0  ;;  %v494_v6 = vsel %vm411_vm1, %v489_v4, -inf }
 0x199   : > { %495 = vmax.xlane.f32.xlu0 %v494_v6 }
 0x226   : > { %v496_v10 = vpop.xlane.xlu0 %495 }
 0x227   : > { %v497_v11 = vmax.f32 %v493_v9, %v496_v10 }
 0x229   : > { %v498_v12 = vsub.f32 %v493_v9, %v497_v11  ;;  %599 = vst.msk [vmem:[#allocation2] sm:$0xff] %vm408_vm3, %v497_v11  ;;  %503 = vperm.xlu0 %1085, %v497_v11  }
 0x22b   : > { %v499_v19 = vmul.f32 1.442695, %v498_v12 }
 0x2a8   : > { %v504_v14 = vpop.permute.xlu0 %503 }
 0x2a9   : > { %v506_v15 = vsub.f32 %v489_v4, %v504_v14 }
 0x2ab   : > { %v507_v16 = vmul.f32 1.442695, %v506_v15 }
 0x2ad   : > { %1087 = vpow2.f32 %v507_v16 }
 0x2ae   : > { %1089 = vpow2.f32 %v499_v19 }
 0x2b7   : > { %v1088_v17 = vpop.eup %1087 }
 0x2b8   : > { %932 = vmatmul.mubr.msk.f32.vlgmr.msra.gmra.mrb[0].mxu1 %vm411_vm1, %v1088_v17  ;;  %v511_v18 = vsel %vm411_vm1, %v1088_v17, 0.0  ;;  %v1090_v20 = vpop.eup %1089 }
 0x2b9   : > { %512 = vadd.xlane.f32.xlu1 %v511_v18  ;;  %936 = vmatprep.mubr.msk.f32.mxu1 %vm1375_vm2, %v1374_v2  ;;  %v510_v23 = vmul.f32 %v1090_v20, %v509_v22 }
 0x2ba   : > { %935 = vmatpush3.msra.mxu1 %v613_v21 }
 0x2ca   : > { %520 = vperm.xlu1 %1086, %v1090_v20  }
 0x346   : > { %v513_v24 = vpop.xlane.xlu1 %512 }
 0x347   : > { %v514_v25 = vadd.f32 %v513_v24, %v510_v23 }
 0x349   : > { %516 = vst.msk [vmem:[#allocation3] sm:$0xff] %vm408_vm3, %v514_v25 }
 0x34a   : > { %v521_v29 = vpop.permute.xlu1 %520 }
 0x34b   : > { %v523_v30 = vmul.f32 %v521_v29, %v517_v28 }
 0x350   : > { %v604_v26 = vld [vmem:[#allocation3] sm:$0xff] }
 0x351   : > { %1091 = vrcp.f32 %v604_v26 }
 0x35b   : > { %v1092_v27 = vpop.eup %1091 }
 0x35c   : > { %608 = vperm.xlu1 %1086, %v1092_v27  }
 0x38b   : > { %v593_v31 = vpop.f32.mrb[0].mxu1 }
 0x38c   : > { %v597_v32 = vadd.f32 %v593_v31, %v523_v30  ;;  %v933_v33 = vpop.f32.mrb[1].mxu1 }
 0x38e   : > { %598 = vst.msk [vmem:[#allocation4] sm:$0xff] %vm411_vm1, %v597_v32 }
 0x395   : > { %v603_v34 = vld [vmem:[#allocation4] sm:$0xff] }
 0x3db   : > { %v609_v35 = vpop.permute.xlu1 %608 }
 0x3dc   : > { %v611_v36 = vmul.f32 %v609_v35, %v603_v34 }
 0x3de   : > { %937 = vmatmul.mubr.msk.f32.vlgmr.msra.gmra.mrb[2].mxu1 %vm411_vm1, %v611_v36 }
 0x4ae   : > { %694 = sbr.rel (!%p690_p6) target bundleno = 1215 (0x4bf), region = 72 }
 0x4b1   : > { %v683_v38 = vpop.f32.mrb[2].mxu1 }
 0x4b2   : > { %v687_v39 = vadd.f32 %v683_v38, %v612_v37  ;;  %v938_v40 = vpop.f32.mrb[3].mxu1 }
 0x4b4   : > { %689 = vst.msk [vmem:[#allocation5] sm:$0xff] %vm688_vm4, %v687_v39 }
 0x4bb   : > { %v695_v41 = vld [vmem:[#allocation5] sm:$0xff] }
 0x4bc   : > { %v703_v43 = vadd.f32 %v911_v42, %v695_v41 }
 0x4be   : > { %705 = vst.msk [vmem:[%s396_s4] sm:$0xff] %vm688_vm4, %v703_v43 }
 0x4bf PF: > { %s1909_s20 = sld [smem:[#allocation23_spill]]  ;;  %s1910_s5 = sld [smem:[#allocation29_spill]] }
 0x4c0   : > { %s1911_s30 = sld [smem:[#allocation33_spill]]  ;;  %s721_s10 = sshll.u32 %s396_s4, 4  ;;  %s722_s10 = int_to_ptr.vmem [resolvable:$true] %s721_s10 }
 0x4c1   : > { %s707_s15 = scalar_lea.sflag [#allocation8], %s394_s14  ;;  %s1213_s28 = scalar_lea.vmem %s722_s10, 128 }
 0x4c2   : > { %p1214_p5 = scmp.ne.s32.totalorder %s722_s10, %s1213_s28  ;;  %s1378_s9 = smov [#allocation14]  }
 0x4c3   : > { %s1217_s16 = sshll.u32 %s1378_s9, 4  ;;  %s1218_s16 = int_to_ptr.vmem [resolvable:$false] %s1217_s16 }
 0x4c4   : > { %s1219_s7 = scalar_lea.vmem %s1218_s16, 256  ;;  %p1220_p8 = scmp.lt.s32.totalorder %s722_s10, %s1218_s16 }
 0x4c5   : > { %s913_s8 = sshll.u32 %s1909_s20, 7  ;;  %p1913_p4 = scmp.ne.s32.totalorder %s1910_s5, 0 }
 0x4c6   : > { %s1912_s12 = smov %s1911_s30  ;;  %s1772_s18 = scalar_lea.hbm %s1911_s30, %s913_s8 }
 0x4c7   : > { %p1215_p1 = pnand %p1214_p5, %p1913_p4  ;;  %p1221_p0 = scmp.lt.s32.totalorder %s1219_s7, %s1213_s28 }
 0x4c9   : > { %p1216_p2 = pneg %p1215_p1  ;;  %p1222_p7 = por %p1221_p0, %p1220_p8 }
 0x4cb   : > { %p1223_p12 = pnand %p1222_p7, %p1216_p2 }
 0x4cd   : > { %1226 = shalt.err (!%p1223_p12)
}
 0x4ce   : > { %s1227_s14 = scalar_lea.hbm %s1772_s18, 128  ;;  %s1231_s13 = scalar_lea.hbm %s1912_s12, 256 }
 0x4cf   : > { %p1228_p11 = scmp.ne.s32.totalorder %s1772_s18, %s1227_s14  ;;  %p1232_p9 = scmp.lt.u32.totalorder %s1772_s18, %s1912_s12 }
 0x4d0   : > { %p1233_p13 = scmp.lt.u32.totalorder %s1231_s13, %s1227_s14  ;;  %p1235_p5 = scmp.lt.u32.totalorder %s1227_s14, %s1772_s18 }
 0x4d1   : > { %p1229_p3 = pnand %p1228_p11, %p1913_p4 }
 0x4d2   : > { %p1234_p6 = por %p1233_p13, %p1232_p9 }
 0x4d3   : > { %p1230_p10 = pneg %p1229_p3 }
 0x4d4   : > { %p1236_p1 = por %p1235_p5, %p1234_p6 }
 0x4d6   : > { %p1237_p2 = pnand %p1236_p1, %p1230_p10 }
 0x4d8   : > { %1240 = shalt.err (!%p1237_p2)
}
 0x4d9   : > { %947 = dma.vmem_to_hbm [thread:$0]  (%p1913_p4), %s722_s10, 128, %s1772_s18, %s707_s15  }
 0x4da PF: > { %s1914_s26 = sld [smem:[#allocation19_spill]]  ;;  %s1915_s20 = sld [smem:[#allocation30_spill]] }
 0x4db   : > { %p967_p8 = scmp.ge.s32.totalorder %s1367_s6, 2 }
 0x4e0   : > { %s733_s8 = sand.u32 1, %s1914_s26   ;;  %p1916_p0 = scmp.ne.s32.totalorder %s1915_s20, 0 }
 0x4e1   : > { %s734_s21 = scalar_lea.sflag [#allocation8], %s733_s8 }
 0x4e2   : > { %p963_p7 = pnand %p967_p8, %p1916_p0 }
 0x4e4   : > { %1310 = dma.done.wait (!%p963_p7), %s734_s21, 128  }
 0x4e5   : > { %1312 = vsyncadd (!%p963_p7), %s734_s21, 4294967168  ;;  %s27_s6 = sadd.s32 1, %s1367_s6   ;;  %s1918_s5 = sld [smem:[#allocation20_spill]] }
 0x4e6   : > { %p1800_p12 = scmp.ge.s32.totalorder %s27_s6, 10   ;;  %s1919_s20 = sld [smem:[#allocation27_spill]] }
 0x4e7   : > { %s1920_s30 = sld [smem:[#allocation21_spill]]  ;;  %s1921_s26 = sld [smem:[#allocation28_spill]] }
 0x4e8   : > { %s1922_s28 = sld [smem:[#allocation24_spill]]  ;;  %s1923_s10 = sld [smem:[#allocation25_spill]] }
 0x4e9   : > { %s1924_s15 = sld [smem:[#allocation26_spill]]  ;;  %s1926_s18 = smov %s1319_s19 }
 0x4ea   : > { %s1928_s21 = smov %s1331_s22  ;;  %s1929_s22 = smov %s1335_s23 }
 0x4eb   : > { %s1927_s19 = smov %s1918_s5  ;;  %s1930_s23 = smov %s1655_s27 }
 0x4ec   : > { %s1931_s24 = smov %s1343_s25  ;;  %s1933_s27 = smov %s1359_s29 }
 0x4ed   : > { %s1932_s25 = smov %s1920_s30  ;;  %26 = sbr.rel (!%p1800_p12) target bundleno = 18 (0x12), region = 138 }
 0x4ee   : > { %s1934_s29 = smov %s1923_s10 }
 0x4ef   : > { %s1935_s30 = smov %s1924_s15 }
 0x4f4   :  { %739 = vsyncpa [#allocation7], 1 }
 0x4f5   :  { %741 = vsyncpa [#allocation7 + $0x1], 1 }
 0x4f6   :  { %742 = vsyncpa [#allocation10], 1 }
 0x4f7   :  { %744 = vsyncpa [#allocation10 + $0x1], 1 }
 0x4f8   :  { %745 = vsyncpa [#allocation13], 1 }
 0x4f9   :  { %747 = vsyncpa [#allocation13 + $0x1], 1 }
 0x4fa   :  { %748 = vsyncpa [#allocation8], 1 }
 0x4fb   :  { %750 = vsyncpa [#allocation8 + $0x1], 1 }

</bundles_post_ra>
